<compile_context>
chip_gen: v6e
topology: v6e:2x2x1
jax: 0.10.0
libtpu: 0.0.40
codegen_flags: <defaults>
</compile_context>

<pallas_src>
import functools

import jax
import jax.numpy as jnp
from jax.experimental import pallas as pl
from jax.experimental.pallas import tpu as pltpu


def _silu(h):
    # sigmoid = 1/(1+exp(-h)); exp and the approx reciprocal both run on the
    # EUP, a separate VLIW slot from the VPU adds/muls around the matmuls.
    return h * pl.reciprocal(1.0 + jnp.exp(-h), approx=True)


def _vecfield_project_kernel(obs_ref, x_ref, t_ref, lbl_ref,
                             w1o_ref, w1x_ref, w1t_ref, w1l_ref, b1_ref,
                             w2_ref, b2_ref, w3_ref, b3_ref,
                             out_ref, *, project: bool):
    """state-MLP vector field (+ optional sphere tangent projection)."""
    x_val = x_ref[...]                # f32 if project else bf16; reused below

    # ---- layer 1: split-W1 matmuls (bf16 operands, f32 accumulation) ----
    h = jnp.dot(obs_ref[...], w1o_ref[...], preferred_element_type=jnp.float32)
    h += jnp.dot(x_val.astype(jnp.bfloat16), w1x_ref[...],
                 preferred_element_type=jnp.float32)
    h += jnp.dot(lbl_ref[...], w1l_ref[...], preferred_element_type=jnp.float32)
    h += t_ref[...] * w1t_ref[...]                  # K=1 column -> VPU broadcast
    h += b1_ref[...]
    h = _silu(h)

    # ---- layer 2 ----
    h = jnp.dot(h.astype(jnp.bfloat16), w2_ref[...],
                preferred_element_type=jnp.float32) + b2_ref[...]
    h = _silu(h)

    # ---- layer 3 ----
    v = jnp.dot(h.astype(jnp.bfloat16), w3_ref[...],
                preferred_element_type=jnp.float32) + b3_ref[...]

    if project:
        # Sphere.proju(x, v) = v - (<x,v>/<x,x>) x, all in f32.
        # Precondition: no all-zero rows of x (same as the PyTorch module).
        x_f32 = x_val
        xv = jnp.sum(x_f32 * v, axis=-1, keepdims=True)
        xx = jnp.sum(x_f32 * x_f32, axis=-1, keepdims=True)
        v = v - (xv * pl.reciprocal(xx, approx=False)) * x_f32

    # NOTE: Dx is narrow (masked lane stores), but the output DMA is fully
    # contiguous in HBM and the large batch tile amortizes the store cost.
    # TODO(synk): optionally emit a lane-dense (Dx, B) output slab if a
    # downstream consumer can accept the transposed layout.
    out_ref[...] = v.astype(out_ref.dtype)


def _round_up(n, m):
    return ((n + m - 1) // m) * m


def wrapped_vf(x, t, *, obs, label, params, use_manifold=True):
    """WrappedVF.forward(x, t) with captured obs/label/params.

    obs:[B,Do] label:[B,Dl] x:[B,Dx] t:[B,1]  ->  [B,Dx] float32
    """
    w1, b1, w2, b2, w3, b3 = params
    B, Dx = x.shape
    Do = obs.shape[-1]
    Dl = label.shape[-1]
    assert w1.shape[0] == Do + Dx + 1 + Dl

    # Split W1 rows to match concat([obs, x, t, label]) -- static slices, so no
    # concatenated-feature tensor ever hits HBM.
    w1_obs = w1[:Do].astype(jnp.bfloat16)
    w1_x = w1[Do:Do + Dx].astype(jnp.bfloat16)
    w1_t = w1[Do + Dx:Do + Dx + 1].astype(jnp.float32)    # (1,H) row, VPU path
    w1_lbl = w1[Do + Dx + 1:].astype(jnp.bfloat16)

    obs_b = obs.astype(jnp.bfloat16)
    lbl_b = label.astype(jnp.bfloat16)
    # x is only needed in f32 when the tangent projection reuses it; the raw
    # vector-field path streams it in bf16 (half the HBM bytes).
    x_stream = x.astype(jnp.float32 if use_manifold else jnp.bfloat16)
    t_f = t.astype(jnp.float32)
    w2_b = w2.astype(jnp.bfloat16)
    w3_b = w3.astype(jnp.bfloat16)
    b1_f = b1.astype(jnp.float32)
    b2_f = b2.astype(jnp.float32)
    b3_f = b3.astype(jnp.float32)

    # Batch tile: live VMEM per step (streamed IO double-buffered + f32 hidden
    # temporaries) is ~2 KiB/row, so TB=1024 stays ~2 MiB -- far below the
    # scoped-VMEM default on every chip -- while amortizing per-step overhead.
    TB = min(1024, _round_up(B, 8))
    B_pad = _round_up(B, TB)
    if B_pad != B:
        pad = B_pad - B
        obs_b = jnp.pad(obs_b, ((0, pad), (0, 0)))
        lbl_b = jnp.pad(lbl_b, ((0, pad), (0, 0)))
        t_f = jnp.pad(t_f, ((0, pad), (0, 0)))
        # padded x rows are all-ones so <x,x> != 0 (rows are dropped below).
        x_stream = jnp.pad(x_stream, ((0, pad), (0, 0)), constant_values=1.0)

    def row_spec(d):
        return pl.BlockSpec((TB, d), lambda i: (i, 0))

    def const_spec(a):
        # Full-array block, constant block index -> DMA'd once, VMEM-resident.
        return pl.BlockSpec(a.shape, lambda i: (0, 0))

    kernel = functools.partial(_vecfield_project_kernel, project=use_manifold)

    out = pl.pallas_call(
        kernel,
        out_shape=jax.ShapeDtypeStruct((B_pad, Dx), jnp.float32),
        grid=(B_pad // TB,),
        in_specs=[row_spec(Do), row_spec(Dx), row_spec(1), row_spec(Dl),
                  const_spec(w1_obs), const_spec(w1_x), const_spec(w1_t),
                  const_spec(w1_lbl), const_spec(b1_f),
                  const_spec(w2_b), const_spec(b2_f),
                  const_spec(w3_b), const_spec(b3_f)],
        out_specs=row_spec(Dx),
        compiler_params=pltpu.CompilerParams(
            dimension_semantics=("parallel",)),
    )(obs_b, x_stream, t_f, lbl_b,
      w1_obs, w1_x, w1_t, w1_lbl, b1_f,
      w2_b, b2_f, w3_b, b3_f)

    return out[:B]


def init_params(key, din, hidden, dout):
    """Deterministic PyTorch-Linear-style init (uniform +-1/sqrt(fan_in))."""
    ks = jax.random.split(key, 6)

    def lin(kw, kb, fan_in, fan_out):
        lim = 1.0 / jnp.sqrt(jnp.float32(fan_in))
        w = jax.random.uniform(kw, (fan_in, fan_out), jnp.float32, -lim, lim)
        b = jax.random.uniform(kb, (1, fan_out), jnp.float32, -lim, lim)
        return w, b

    w1, b1 = lin(ks[0], ks[1], din, hidden)
    w2, b2 = lin(ks[2], ks[3], hidden, hidden)
    w3, b3 = lin(ks[4], ks[5], hidden, dout)
    return (w1, b1, w2, b2, w3, b3)


def _reference(obs, x, t, label, params):
    """Pure-JAX f32 reference. Returns (projected, raw_vecfield)."""
    w1, b1, w2, b2, w3, b3 = params
    feat = jnp.concatenate([obs, x, t, label], axis=-1).astype(jnp.float32)
    h = feat @ w1 + b1
    h = h * jax.nn.sigmoid(h)
    h = h @ w2 + b2
    h = h * jax.nn.sigmoid(h)
    v = h @ w3 + b3
    xv = jnp.sum(x * v, axis=-1, keepdims=True)
    xx = jnp.sum(x * x, axis=-1, keepdims=True)
    return v - (xv / xx) * x, v


if __name__ == "__main__":
    # hidden widened 64 -> 128 to fill the 128-lane vreg / MXU columns.
    B, OBS_D, X_D, LABEL_D, HIDDEN = 8, 16, 8, 4, 128

    key = jax.random.PRNGKey(0)
    k_obs, k_x, k_t, k_lbl, k_par = jax.random.split(key, 5)

    obs = jax.random.normal(k_obs, (B, OBS_D), jnp.float32)
    x = jax.random.normal(k_x, (B, X_D), jnp.float32)
    x = x / jnp.linalg.norm(x, axis=-1, keepdims=True)       # points on sphere
    t = jax.random.uniform(k_t, (B, 1), jnp.float32)
    label = jax.random.normal(k_lbl, (B, LABEL_D), jnp.float32)

    params = init_params(k_par, OBS_D + X_D + 1 + LABEL_D, HIDDEN, X_D)

    out = wrapped_vf(x, t, obs=obs, label=label, params=params)
    out = jax.block_until_ready(out)
    out_raw = wrapped_vf(x, t, obs=obs, label=label, params=params,
                         use_manifold=False)
    out_raw = jax.block_until_ready(out_raw)

    ref_proj, ref_v = _reference(obs, x, t, label, params)
    assert out.shape == (B, X_D)
    assert out_raw.shape == (B, X_D)
    # bf16 MXU operands + EUP approx sigmoid vs a pure-f32 reference -> a
    # loose tolerance; real bugs produce O(0.1-1) errors, far above this.
    assert jnp.allclose(out, ref_proj, atol=5e-2, rtol=5e-2)
    assert jnp.allclose(out_raw, ref_v, atol=5e-2, rtol=5e-2)
    # tangency check (projection runs in f32 inside the kernel): <x, v> ~ 0
    assert jnp.max(jnp.abs(jnp.sum(out * x, axis=-1))) < 1e-3

    print("KERNEL_OK")
</pallas_src>

<mosaic_0001>
module attributes {stable_mosaic.version = 11 : i64} {
  func.func @_vecfield_project_kernel(%arg0: i32, %arg1: memref<8x16xbf16, #tpu.memory_space<vmem>>, %arg2: memref<8x8xf32, #tpu.memory_space<vmem>>, %arg3: memref<8x1xf32, #tpu.memory_space<vmem>>, %arg4: memref<8x4xbf16, #tpu.memory_space<vmem>>, %arg5: memref<16x128xbf16, #tpu.memory_space<vmem>>, %arg6: memref<8x128xbf16, #tpu.memory_space<vmem>>, %arg7: memref<1x128xf32, #tpu.memory_space<vmem>>, %arg8: memref<4x128xbf16, #tpu.memory_space<vmem>>, %arg9: memref<1x128xf32, #tpu.memory_space<vmem>>, %arg10: memref<128x128xbf16, #tpu.memory_space<vmem>>, %arg11: memref<1x128xf32, #tpu.memory_space<vmem>>, %arg12: memref<128x8xbf16, #tpu.memory_space<vmem>>, %arg13: memref<1x8xf32, #tpu.memory_space<vmem>>, %arg14: memref<8x8xf32, #tpu.memory_space<vmem>>) attributes {dimension_semantics = [#tpu.dimension_semantics<parallel>], iteration_bounds = array<i64: 1>, scalar_prefetch = 0 : i64, scratch_operands = 0 : i64, tpu.core_type = #tpu.core_type<tc>, window_params = [{transform_indices = @transform_0, window_bounds = array<i64: 8, 16>}, {transform_indices = @transform_1, window_bounds = array<i64: 8, 8>}, {transform_indices = @transform_2, window_bounds = array<i64: 8, 1>}, {transform_indices = @transform_3, window_bounds = array<i64: 8, 4>}, {pipeline_mode = #tpu.pipeline_mode<synchronous>, transform_indices = @transform_4, window_bounds = array<i64: 16, 128>}, {pipeline_mode = #tpu.pipeline_mode<synchronous>, transform_indices = @transform_5, window_bounds = array<i64: 8, 128>}, {pipeline_mode = #tpu.pipeline_mode<synchronous>, transform_indices = @transform_6, window_bounds = array<i64: 1, 128>}, {pipeline_mode = #tpu.pipeline_mode<synchronous>, transform_indices = @transform_7, window_bounds = array<i64: 4, 128>}, {pipeline_mode = #tpu.pipeline_mode<synchronous>, transform_indices = @transform_8, window_bounds = array<i64: 1, 128>}, {pipeline_mode = #tpu.pipeline_mode<synchronous>, transform_indices = @transform_9, window_bounds = array<i64: 128, 128>}, {pipeline_mode = #tpu.pipeline_mode<synchronous>, transform_indices = @transform_10, window_bounds = array<i64: 1, 128>}, {pipeline_mode = #tpu.pipeline_mode<synchronous>, transform_indices = @transform_11, window_bounds = array<i64: 128, 8>}, {pipeline_mode = #tpu.pipeline_mode<synchronous>, transform_indices = @transform_12, window_bounds = array<i64: 1, 8>}, {transform_indices = @transform_13, window_bounds = array<i64: 8, 8>}]} {
    %c0 = arith.constant 0 : index
    %c0_0 = arith.constant 0 : index
    %0 = vector.load %arg2[%c0, %c0_0] : memref<8x8xf32, #tpu.memory_space<vmem>>, vector<8x8xf32>
    %c0_1 = arith.constant 0 : index
    %c0_2 = arith.constant 0 : index
    %1 = vector.load %arg1[%c0_1, %c0_2] : memref<8x16xbf16, #tpu.memory_space<vmem>>, vector<8x16xbf16>
    %c0_3 = arith.constant 0 : index
    %c0_4 = arith.constant 0 : index
    %2 = vector.load %arg5[%c0_3, %c0_4] : memref<16x128xbf16, #tpu.memory_space<vmem>>, vector<16x128xbf16>
    %cst = arith.constant dense<0.000000e+00> : vector<8x128xf32>
    %3 = tpu.matmul %1, %2, %cst {dimension_numbers = #tpu.dot_dimension_numbers<[1], [0], [0], [1], [0, 0, 1, 1], [], []>} : vector<8x16xbf16>, vector<16x128xbf16>, vector<8x128xf32> -> vector<8x128xf32>
    %4 = arith.truncf %0 : vector<8x8xf32> to vector<8x8xbf16>
    %c0_5 = arith.constant 0 : index
    %c0_6 = arith.constant 0 : index
    %5 = vector.load %arg6[%c0_5, %c0_6] : memref<8x128xbf16, #tpu.memory_space<vmem>>, vector<8x128xbf16>
    %cst_7 = arith.constant dense<0.000000e+00> : vector<8x128xf32>
    %6 = tpu.matmul %4, %5, %cst_7 {dimension_numbers = #tpu.dot_dimension_numbers<[1], [0], [0], [1], [0, 0, 1, 1], [], []>} : vector<8x8xbf16>, vector<8x128xbf16>, vector<8x128xf32> -> vector<8x128xf32>
    %7 = arith.addf %3, %6 : vector<8x128xf32>
    %c0_8 = arith.constant 0 : index
    %c0_9 = arith.constant 0 : index
    %8 = vector.load %arg4[%c0_8, %c0_9] : memref<8x4xbf16, #tpu.memory_space<vmem>>, vector<8x4xbf16>
    %c0_10 = arith.constant 0 : index
    %c0_11 = arith.constant 0 : index
    %9 = vector.load %arg8[%c0_10, %c0_11] : memref<4x128xbf16, #tpu.memory_space<vmem>>, vector<4x128xbf16>
    %cst_12 = arith.constant dense<0.000000e+00> : vector<8x128xf32>
    %10 = tpu.matmul %8, %9, %cst_12 {dimension_numbers = #tpu.dot_dimension_numbers<[1], [0], [0], [1], [0, 0, 1, 1], [], []>} : vector<8x4xbf16>, vector<4x128xbf16>, vector<8x128xf32> -> vector<8x128xf32>
    %11 = arith.addf %7, %10 : vector<8x128xf32>
    %c0_13 = arith.constant 0 : index
    %c0_14 = arith.constant 0 : index
    %12 = vector.load %arg3[%c0_13, %c0_14] : memref<8x1xf32, #tpu.memory_space<vmem>>, vector<8x1xf32>
    %c0_15 = arith.constant 0 : index
    %c0_16 = arith.constant 0 : index
    %13 = vector.load %arg7[%c0_15, %c0_16] : memref<1x128xf32, #tpu.memory_space<vmem>>, vector<1x128xf32>
    %14 = vector.broadcast %12 : vector<8x1xf32> to vector<8x128xf32>
    %15 = vector.broadcast %13 : vector<1x128xf32> to vector<8x128xf32>
    %16 = arith.mulf %14, %15 : vector<8x128xf32>
    %17 = arith.addf %11, %16 : vector<8x128xf32>
    %c0_17 = arith.constant 0 : index
    %c0_18 = arith.constant 0 : index
    %18 = vector.load %arg9[%c0_17, %c0_18] : memref<1x128xf32, #tpu.memory_space<vmem>>, vector<1x128xf32>
    %19 = vector.broadcast %18 : vector<1x128xf32> to vector<8x128xf32>
    %20 = arith.addf %17, %19 : vector<8x128xf32>
    %cst_19 = arith.constant 0.000000e+00 : f32
    %21 = vector.broadcast %cst_19 : f32 to vector<8x128xf32>
    %22 = arith.subf %21, %20 : vector<8x128xf32>
    %23 = math.exp %22 : vector<8x128xf32>
    %cst_20 = arith.constant 1.000000e+00 : f32
    %24 = vector.broadcast %cst_20 : f32 to vector<8x128xf32>
    %25 = arith.addf %24, %23 : vector<8x128xf32>
    %26 = tpu.reciprocal %25 {approx = true} : vector<8x128xf32> -> vector<8x128xf32>
    %27 = arith.mulf %20, %26 : vector<8x128xf32>
    %28 = arith.truncf %27 : vector<8x128xf32> to vector<8x128xbf16>
    %c0_21 = arith.constant 0 : index
    %c0_22 = arith.constant 0 : index
    %29 = vector.load %arg10[%c0_21, %c0_22] : memref<128x128xbf16, #tpu.memory_space<vmem>>, vector<128x128xbf16>
    %cst_23 = arith.constant dense<0.000000e+00> : vector<8x128xf32>
    %30 = tpu.matmul %28, %29, %cst_23 {dimension_numbers = #tpu.dot_dimension_numbers<[1], [0], [0], [1], [0, 0, 1, 1], [], []>} : vector<8x128xbf16>, vector<128x128xbf16>, vector<8x128xf32> -> vector<8x128xf32>
    %c0_24 = arith.constant 0 : index
    %c0_25 = arith.constant 0 : index
    %31 = vector.load %arg11[%c0_24, %c0_25] : memref<1x128xf32, #tpu.memory_space<vmem>>, vector<1x128xf32>
    %32 = vector.broadcast %31 : vector<1x128xf32> to vector<8x128xf32>
    %33 = arith.addf %30, %32 : vector<8x128xf32>
    %cst_26 = arith.constant 0.000000e+00 : f32
    %34 = vector.broadcast %cst_26 : f32 to vector<8x128xf32>
    %35 = arith.subf %34, %33 : vector<8x128xf32>
    %36 = math.exp %35 : vector<8x128xf32>
    %cst_27 = arith.constant 1.000000e+00 : f32
    %37 = vector.broadcast %cst_27 : f32 to vector<8x128xf32>
    %38 = arith.addf %37, %36 : vector<8x128xf32>
    %39 = tpu.reciprocal %38 {approx = true} : vector<8x128xf32> -> vector<8x128xf32>
    %40 = arith.mulf %33, %39 : vector<8x128xf32>
    %41 = arith.truncf %40 : vector<8x128xf32> to vector<8x128xbf16>
    %c0_28 = arith.constant 0 : index
    %c0_29 = arith.constant 0 : index
    %42 = vector.load %arg12[%c0_28, %c0_29] : memref<128x8xbf16, #tpu.memory_space<vmem>>, vector<128x8xbf16>
    %cst_30 = arith.constant dense<0.000000e+00> : vector<8x8xf32>
    %43 = tpu.matmul %41, %42, %cst_30 {dimension_numbers = #tpu.dot_dimension_numbers<[1], [0], [0], [1], [0, 0, 1, 1], [], []>} : vector<8x128xbf16>, vector<128x8xbf16>, vector<8x8xf32> -> vector<8x8xf32>
    %c0_31 = arith.constant 0 : index
    %c0_32 = arith.constant 0 : index
    %44 = vector.load %arg13[%c0_31, %c0_32] : memref<1x8xf32, #tpu.memory_space<vmem>>, vector<1x8xf32>
    %45 = vector.broadcast %44 : vector<1x8xf32> to vector<8x8xf32>
    %46 = arith.addf %43, %45 : vector<8x8xf32>
    %47 = arith.mulf %0, %46 : vector<8x8xf32>
    %cst_33 = arith.constant dense<0.000000e+00> : vector<8xf32>
    %48 = vector.multi_reduction <add>, %47, %cst_33 [1] : vector<8x8xf32> to vector<8xf32>
    %49 = vector.shape_cast %48 : vector<8xf32> to vector<8x1xf32>
    %50 = arith.mulf %0, %0 : vector<8x8xf32>
    %cst_34 = arith.constant dense<0.000000e+00> : vector<8xf32>
    %51 = vector.multi_reduction <add>, %50, %cst_34 [1] : vector<8x8xf32> to vector<8xf32>
    %52 = vector.shape_cast %51 : vector<8xf32> to vector<8x1xf32>
    %53 = tpu.reciprocal %52 : vector<8x1xf32> -> vector<8x1xf32>
    %54 = arith.mulf %49, %53 : vector<8x1xf32>
    %55 = vector.broadcast %54 : vector<8x1xf32> to vector<8x8xf32>
    %56 = arith.mulf %55, %0 : vector<8x8xf32>
    %57 = arith.subf %46, %56 : vector<8x8xf32>
    %c0_35 = arith.constant 0 : index
    %c0_36 = arith.constant 0 : index
    %58 = vector.load %arg14[%c0_35, %c0_36] : memref<8x8xf32, #tpu.memory_space<vmem>>, vector<8x8xf32>
    tpu.vector_store %arg14[%c0_35, %c0_36], %57 {strides = array<i32>} : memref<8x8xf32, #tpu.memory_space<vmem>>, vector<8x8xf32>,
    return
  }
  func.func @transform_0(%arg0: i32) -> (i32, i32) {
    %c0_i32 = arith.constant 0 : i32
    %c0_i32_0 = arith.constant 0 : i32
    return %arg0, %c0_i32 : i32, i32
  }
  func.func @transform_1(%arg0: i32) -> (i32, i32) {
    %c0_i32 = arith.constant 0 : i32
    %c0_i32_0 = arith.constant 0 : i32
    return %arg0, %c0_i32 : i32, i32
  }
  func.func @transform_2(%arg0: i32) -> (i32, i32) {
    %c0_i32 = arith.constant 0 : i32
    %c0_i32_0 = arith.constant 0 : i32
    return %arg0, %c0_i32 : i32, i32
  }
  func.func @transform_3(%arg0: i32) -> (i32, i32) {
    %c0_i32 = arith.constant 0 : i32
    %c0_i32_0 = arith.constant 0 : i32
    return %arg0, %c0_i32 : i32, i32
  }
  func.func @transform_4(%arg0: i32) -> (i32, i32) {
    %c0_i32 = arith.constant 0 : i32
    %c0_i32_0 = arith.constant 0 : i32
    %c0_i32_1 = arith.constant 0 : i32
    return %c0_i32, %c0_i32_0 : i32, i32
  }
  func.func @transform_5(%arg0: i32) -> (i32, i32) {
    %c0_i32 = arith.constant 0 : i32
    %c0_i32_0 = arith.constant 0 : i32
    %c0_i32_1 = arith.constant 0 : i32
    return %c0_i32, %c0_i32_0 : i32, i32
  }
  func.func @transform_6(%arg0: i32) -> (i32, i32) {
    %c0_i32 = arith.constant 0 : i32
    %c0_i32_0 = arith.constant 0 : i32
    %c0_i32_1 = arith.constant 0 : i32
    return %c0_i32, %c0_i32_0 : i32, i32
  }
  func.func @transform_7(%arg0: i32) -> (i32, i32) {
    %c0_i32 = arith.constant 0 : i32
    %c0_i32_0 = arith.constant 0 : i32
    %c0_i32_1 = arith.constant 0 : i32
    return %c0_i32, %c0_i32_0 : i32, i32
  }
  func.func @transform_8(%arg0: i32) -> (i32, i32) {
    %c0_i32 = arith.constant 0 : i32
    %c0_i32_0 = arith.constant 0 : i32
    %c0_i32_1 = arith.constant 0 : i32
    return %c0_i32, %c0_i32_0 : i32, i32
  }
  func.func @transform_9(%arg0: i32) -> (i32, i32) {
    %c0_i32 = arith.constant 0 : i32
    %c0_i32_0 = arith.constant 0 : i32
    %c0_i32_1 = arith.constant 0 : i32
    return %c0_i32, %c0_i32_0 : i32, i32
  }
  func.func @transform_10(%arg0: i32) -> (i32, i32) {
    %c0_i32 = arith.constant 0 : i32
    %c0_i32_0 = arith.constant 0 : i32
    %c0_i32_1 = arith.constant 0 : i32
    return %c0_i32, %c0_i32_0 : i32, i32
  }
  func.func @transform_11(%arg0: i32) -> (i32, i32) {
    %c0_i32 = arith.constant 0 : i32
    %c0_i32_0 = arith.constant 0 : i32
    %c0_i32_1 = arith.constant 0 : i32
    return %c0_i32, %c0_i32_0 : i32, i32
  }
  func.func @transform_12(%arg0: i32) -> (i32, i32) {
    %c0_i32 = arith.constant 0 : i32
    %c0_i32_0 = arith.constant 0 : i32
    %c0_i32_1 = arith.constant 0 : i32
    return %c0_i32, %c0_i32_0 : i32, i32
  }
  func.func @transform_13(%arg0: i32) -> (i32, i32) {
    %c0_i32 = arith.constant 0 : i32
    %c0_i32_0 = arith.constant 0 : i32
    return %arg0, %c0_i32 : i32, i32
  }
}

</mosaic_0001>

<bundles_post_ra>
// kernel: tpu_custom_call.1
= control target key start
LH: loop header
LB: loop body
LE: loop exit
PB: predicated region body
PF: predicated region fallthrough
CT: control target
= control target key end

     0   :  { %vm56_vm0 = vcmask 1043456   ;;  %v647_v1 = vmov 0.0   ;;  %vm648_vm1 = vmmov 0   ;;  %vm52_vm2 = vcmask 64512   ;;  %s846_s0 = inlined_call_operand.vmem [shape: bf16[8,16], index: 0, kind: input, shape index: {}]   ;;  %s847_s1 = inlined_call_operand.vmem [shape: f32[8,8], index: 1, kind: input, shape index: {}]   ;;  %s848_s2 = inlined_call_operand.vmem [shape: f32[8,1], index: 2, kind: input, shape index: {}]   ;;  %s849_s3 = inlined_call_operand.vmem [shape: bf16[8,4], index: 3, kind: input, shape index: {}]   ;;  %s850_s4 = inlined_call_operand.vmem [shape: bf16[16,128], index: 4, kind: input, shape index: {}]   ;;  %s851_s5 = inlined_call_operand.vmem [shape: bf16[8,128], index: 5, kind: input, shape index: {}]   ;;  %s852_s6 = inlined_call_operand.vmem [shape: f32[1,128], index: 6, kind: input, shape index: {}]   ;;  %s853_s7 = inlined_call_operand.vmem [shape: bf16[4,128], index: 7, kind: input, shape index: {}]   ;;  %s854_s8 = inlined_call_operand.vmem [shape: f32[1,128], index: 8, kind: input, shape index: {}]   ;;  %s855_s9 = inlined_call_operand.vmem [shape: bf16[128,128], index: 9, kind: input, shape index: {}]   ;;  %s856_s10 = inlined_call_operand.vmem [shape: f32[1,128], index: 10, kind: input, shape index: {}]   ;;  %s857_s11 = inlined_call_operand.vmem [shape: bf16[128,8], index: 11, kind: input, shape index: {}]   ;;  %s858_s12 = inlined_call_operand.vmem [shape: f32[1,8], index: 12, kind: input, shape index: {}]   ;;  %s859_s13 = inlined_call_operand.hbm [shape: f32[8,8], index: 13, kind: output, shape index: {}]  }
   0x1   :  { %v51_v0 = vld [vmem:[%s851_s5] sm:$0xf]  ;;  %535 = vmatprep.subr.bf16.mxu0 %v647_v1  ;;  %541 = vmatprep.subr.bf16.mxu1 %v647_v1  ;;  %vm106_vm3 = vcmask 130048   ;;  %vm156_vm4 = vcmask 1041408   ;;  %vm152_vm5 = vcmask 31744   ;;  %v649_v10 = vmov 0  }
   0x2   :  { %v58_v2 = vsel %vm56_vm0, %v51_v0, 0  ;;  %v598_v3 = vld [vmem:[%s850_s4] sm:$0xff]   ;;  %537 = vmatprep.mubr.msk.bf16.mxu0 %vm648_vm1, %v647_v1  ;;  %543 = vmatprep.mubr.msk.bf16.mxu1 %vm648_vm1, %v647_v1 }
   0x3   :  { %v732_v4 = vld [vmem:[%s847_s1] sm:$0xff]  ;;  %536 = vmatpush3.bf16.msra.mxu0 %v58_v2  ;;  %542 = vmatpush3.bf16.msra.mxu1 %v598_v3 }
   0x4   :  { %v50_v5 = vpack.c.bf16 %v732_v4, %v732_v4  ;;  %v151_v6 = vld [vmem:[%s853_s7] sm:$0x3]  ;;  %547 = vmatprep.subr.bf16.mxu0 %v647_v1  ;;  %597 = vset.pattern.permute.xlu0 %v649_v10 }
   0x5   :  { %v47_v7 = vld [vmem:[%s846_s0] sm:$0xf]  ;;  %v158_v9 = vsel %vm156_vm4, %v151_v6, 0  ;;  %553 = vmatprep.subr.bf16.mxu1 %v647_v1 }
   0x6   :  { %v201_v8 = vld [vmem:[%s848_s2] sm:$0xff]  ;;  %538 = vmatmul.mubr.msk.bf16.vlgmr.msra.gmra.mxu0 %vm52_vm2, %v50_v5  ;;  %544 = vmatmul.mubr.msk.bf16.vlgmr.msra.gmra.mxu1 %vm106_vm3, %v47_v7 }
   0x7   :  { %205 = vperm.xlu0 %597, %v201_v8   ;;  %548 = vmatpush3.bf16.msra.mxu0 %v158_v9  ;;  %v150_v11 = vld [vmem:[%s849_s3] sm:$0xf] }
   0x8   :  { %549 = vmatprep.mubr.msk.bf16.mxu0 %vm648_vm1, %v647_v1  ;;  %569 = vmatprep.mubr.msk.bf16.mxu1 %vm648_vm1, %v647_v1 }
   0x9   :  { %573 = vmatprep.subr.bf16.mxu0 %v647_v1 }
   0xe   :  { %550 = vmatmul.mubr.msk.bf16.vlgmr.msra.gmra.mxu0 %vm152_vm5, %v150_v11 }
   0xf   :  { %589 = vmatprep.mubr.msk.bf16.mxu0 %vm648_vm1, %v647_v1 }
  0x10   :  { %18 = vsyncpa [#allocation3], 0  ;;  %v599_v12 = vld [vmem:[%s855_s9 + $0x38] sm:$0xff]   ;;  %v600_v13 = vld [vmem:[%s855_s9 + $0x30] sm:$0xff]   ;;  %v464_v55 = vmul.f32 %v732_v4, %v732_v4 }
  0x11   :  { %554 = vmatpush3.bf16.msra.mxu1 %v599_v12  ;;  %v601_v14 = vld [vmem:[%s855_s9 + $0x28] sm:$0xff]   ;;  %v602_v15 = vld [vmem:[%s855_s9 + $0x20] sm:$0xff]   ;;  %v603_v16 = vld [vmem:[%s855_s9 + $0x18] sm:$0xff]  }
  0x12   :  { %555 = vmatprep.subr.bf16.mxu1 %v647_v1  ;;  %v604_v17 = vld [vmem:[%s855_s9 + $0x10] sm:$0xff]   ;;  %v605_v18 = vld [vmem:[%s855_s9 + $0x8] sm:$0xff]   ;;  %v606_v19 = vld [vmem:[%s855_s9] sm:$0xff]   ;;  %v465_v56 = vsel %vm52_vm2, %v464_v55, 0.0 }
  0x13   :  { %v491_v25 = vld [vmem:[%s852_s6] ss:$0 sm:$0xff]  ;;  %v607_v47 = vld [vmem:[%s857_s11 + $0x38] sm:$0xff]   ;;  %v608_v48 = vld [vmem:[%s857_s11 + $0x30] sm:$0xff]  }
  0x14   :  { %v492_v34 = vld [vmem:[%s854_s8] ss:$0 sm:$0xff]  ;;  %574 = vmatpush3.bf16.msra.mxu0 %v607_v47  ;;  %v609_v49 = vld [vmem:[%s857_s11 + $0x28] sm:$0xff]   ;;  %v611_v51 = vld [vmem:[%s857_s11 + $0x18] sm:$0xff]  }
  0x15   :  { %556 = vmatpush3.bf16.msra.mxu1 %v600_v13  ;;  %575 = vmatprep.subr.bf16.mxu0 %v647_v1  ;;  %v610_v50 = vld [vmem:[%s857_s11 + $0x20] sm:$0xff]   ;;  %v612_v52 = vld [vmem:[%s857_s11 + $0x10] sm:$0xff]   ;;  %v613_v53 = vld [vmem:[%s857_s11 + $0x8] sm:$0xff]  }
  0x16   :  { %557 = vmatprep.subr.bf16.mxu1 %v647_v1  ;;  %v614_v54 = vld [vmem:[%s857_s11] sm:$0xff]  }
  0x17   :  { %v493_v57 = vld [vmem:[%s856_s10] ss:$0 sm:$0xff]  ;;  %s650_s10 = smov [#allocation2]  }
  0x18   :  { %576 = vmatpush3.bf16.msra.mxu0 %v608_v48  ;;  %v502_v7 = vld [vmem:[%s858_s12] ss:$0 sm:$0xff]  ;;  %s479_s27 = sshll.u32 %s650_s10, 4  ;;  %s480_s27 = int_to_ptr.vmem [resolvable:$true] %s479_s27 }
  0x19   :  { %558 = vmatpush3.bf16.msra.mxu1 %v601_v14  ;;  %577 = vmatprep.subr.bf16.mxu0 %v647_v1  ;;  %s625_s12 = scalar_lea.vmem %s480_s27, 128  ;;  %p630_p1 = scmp.lt.s32.totalorder %s480_s27, %s480_s27 }
  0x1a   :  { %559 = vmatprep.subr.bf16.mxu1 %v647_v1  ;;  %p626_p0 = scmp.ne.s32.totalorder %s480_s27, %s625_s12  ;;  %p631_p2 = scmp.lt.s32.totalorder %s625_s12, %s625_s12 }
  0x1c   :  { %578 = vmatpush3.bf16.msra.mxu0 %v609_v49  ;;  %p632_p3 = por %p631_p2, %p630_p1 }
  0x1d   :  { %560 = vmatpush3.bf16.msra.mxu1 %v602_v15  ;;  %579 = vmatprep.subr.bf16.mxu0 %v647_v1 }
  0x1e   :  { %561 = vmatprep.subr.bf16.mxu1 %v647_v1  ;;  %p633_p4 = pnand %p632_p3, %p626_p0 }
  0x20   :  { %580 = vmatpush3.bf16.msra.mxu0 %v610_v50 }
  0x21   :  { %562 = vmatpush3.bf16.msra.mxu1 %v603_v16  ;;  %581 = vmatprep.subr.bf16.mxu0 %v647_v1 }
  0x22   :  { %563 = vmatprep.subr.bf16.mxu1 %v647_v1 }
  0x24   :  { %582 = vmatpush3.bf16.msra.mxu0 %v611_v51 }
  0x25   :  { %564 = vmatpush3.bf16.msra.mxu1 %v604_v17  ;;  %583 = vmatprep.subr.bf16.mxu0 %v647_v1 }
  0x26   :  { %565 = vmatprep.subr.bf16.mxu1 %v647_v1  ;;  %466 = vadd.xlane.f32.xlu0 %v465_v56 }
  0x28   :  { %584 = vmatpush3.bf16.msra.mxu0 %v612_v52 }
  0x29   :  { %566 = vmatpush3.bf16.msra.mxu1 %v605_v18  ;;  %585 = vmatprep.subr.bf16.mxu0 %v647_v1 }
  0x2a   :  { %567 = vmatprep.subr.bf16.mxu1 %v647_v1 }
  0x2c   :  { %586 = vmatpush3.bf16.msra.mxu0 %v613_v53 }
  0x2d   :  { %568 = vmatpush3.bf16.msra.mxu1 %v606_v19  ;;  %587 = vmatprep.subr.bf16.mxu0 %v647_v1 }
  0x30   :  { %588 = vmatpush3.bf16.msra.mxu0 %v614_v54 }
  0x82   :  { %v206_v26 = vpop.permute.xlu0 %205 }
  0x83   :  { %v214_v31 = vmul.f32 %v491_v25, %v206_v26 }
  0xaf   :  { %v467_v15 = vpop.xlane.xlu0 %466 }
  0xc6   :  { %v94_v20 = vpop.f32.mrf.mxu0  ;;  %v144_v21 = vpop.f32.mrf.mxu1 }
  0xc7   :  { %v145_v29 = vadd.f32 %v144_v21, %v94_v20 }
  0xc8   :  { %v539_v22 = vpop.f32.mrf.mxu0  ;;  %v545_v23 = vpop.f32.mrf.mxu1 }
  0xca   :  { %v97_v24 = vpop.f32.mrf.mxu0  ;;  %v147_v27 = vpop.f32.mrf.mxu1 }
  0xcc   :  { %v540_v28 = vpop.f32.mrf.mxu0  ;;  %v546_v30 = vpop.f32.mrf.mxu1 }
  0xce   :  { %v194_v32 = vpop.f32.mrf.mxu0 }
  0xcf   :  { %v200_v33 = vadd.f32 %v194_v32, %v145_v29 }
  0xd0   :  { %v551_v35 = vpop.f32.mrf.mxu0 }
  0xd1   :  { %v215_v36 = vadd.f32 %v214_v31, %v200_v33 }
  0xd2   :  { %v197_v37 = vpop.f32.mrf.mxu0 }
  0xd3   :  { %v223_v38 = vadd.f32 %v492_v34, %v215_v36 }
  0xd4   :  { %v552_v39 = vpop.f32.mrf.mxu0 }
  0xd5   :  { %v224_v40 = vsub.f32 0.0, %v223_v38 }
  0xd7   :  { %v225_v41 = vmul.f32 1.442695, %v224_v40 }
  0xd9   :  { %615 = vpow2.f32 %v225_v41 }
  0xe6   :  { %v616_v42 = vpop.eup %615 }
  0xe7   :  { %v227_v43 = vadd.f32 1.0, %v616_v42 }
  0xe9   :  { %617 = vrcp.f32 %v227_v43 }
  0xf6   :  { %v618_v44 = vpop.eup %617 }
  0xf7   :  { %v229_v45 = vmul.f32 %v618_v44, %v223_v38 }
  0xf9   :  { %v230_v46 = vpack.c.bf16 %v229_v45, %v229_v45 }
  0xfb   :  { %570 = vmatmul.mubr.bf16.vlgmr.msra.gmra.mxu1 %v230_v46 }
 0x1bb   :  { %v336_v58 = vpop.f32.mrf.mxu1 }
 0x1bc   :  { %v337_v59 = vadd.f32 %v493_v57, %v336_v58 }
 0x1bd   :  { %v571_v60 = vpop.f32.mrf.mxu1 }
 0x1be   :  { %v342_v61 = vsub.f32 0.0, %v337_v59 }
 0x1bf   :  { %v339_v62 = vpop.f32.mrf.mxu1 }
 0x1c0   :  { %v343_v63 = vmul.f32 1.442695, %v342_v61 }
 0x1c1   :  { %v572_v0 = vpop.f32.mrf.mxu1 }
 0x1c2   :  { %619 = vpow2.f32 %v343_v63 }
 0x1cf   :  { %v620_v1 = vpop.eup %619 }
 0x1d0   :  { %v345_v2 = vadd.f32 1.0, %v620_v1 }
 0x1d2   :  { %621 = vrcp.f32 %v345_v2 }
 0x1d3   :  { %623 = vrcp.f32 %v467_v15 }
 0x1df   :  { %v622_v3 = vpop.eup %621 }
 0x1e0   :  { %v347_v5 = vmul.f32 %v622_v3, %v337_v59  ;;  %v624_v16 = vpop.eup %623 }
 0x1e2   :  { %v348_v6 = vpack.c.bf16 %v347_v5, %v347_v5 }
 0x1e4   :  { %590 = vmatmul.mubr.bf16.vlgmr.msra.gmra.mxu0 %v348_v6 }
 0x2a4   :  { %v454_v8 = vpop.f32.mrf.mxu0 }
 0x2a5   :  { %v455_v9 = vadd.f32 %v502_v7, %v454_v8 }
 0x2a6   :  { %v591_v10 = vpop.f32.mrf.mxu0 }
 0x2a7   :  { %v460_v11 = vmul.f32 %v455_v9, %v732_v4 }
 0x2a8   :  { %v457_v12 = vpop.f32.mrf.mxu0 }
 0x2a9   :  { %v461_v13 = vsel %vm52_vm2, %v460_v11, 0.0 }
 0x2aa   :  { %462 = vadd.xlane.f32.xlu1 %v461_v13  ;;  %v592_v14 = vpop.f32.mrf.mxu0 }
 0x333   :  { %v463_v17 = vpop.xlane.xlu1 %462 }
 0x334   :  { %v469_v18 = vmul.f32 %v624_v16, %v463_v17 }
 0x336   :  { %v470_v19 = vmul.f32 %v469_v18, %v732_v4 }
 0x338   :  { %v471_v20 = vsub.f32 %v455_v9, %v470_v19 }
 0x33a   :  { %472 = vst.msk [vmem:[#allocation2] sm:$0xff] %vm52_vm2, %v471_v20 }
 0x33b   :  { %636 = shalt.err (!%p633_p4)
}
 0x33c   :  { %482 = dma.vmem_to_hbm [thread:$0]  %s480_s27, 128, %s859_s13, [#allocation3]  }
 0x33d   :  { %645 = dma.done.wait [#allocation3], 128  }
 0x33e   :  { %646 = vsyncadd [#allocation3], 4294967168 }
 0x33f   :  { %486 = vsyncpa [#allocation3], 1 }

</bundles_post_ra>
